<compile_context>
chip_gen: v7x
topology: tpu7x:2x2x1
jax: 0.10.0
libtpu: 0.0.40
codegen_flags: <defaults>
</compile_context>

<pallas_src>
import functools

import jax
import jax.numpy as jnp
from jax import lax
from jax.experimental import pallas as pl
from jax.experimental.pallas import tpu as pltpu

_NEG = -1e30  # finite "minus infinity" for padded vocab columns / max init


def _round_up(x, m):
    return (x + m - 1) // m * m


def _next_pow2(n):
    return 1 << max(int(n) - 1, 0).bit_length() if n > 1 else 1


def _vmem_capacity():
    try:
        return int(pltpu.get_tpu_info().vmem_capacity_bytes)
    except Exception:
        return 64 * 1024 * 1024  # conservative (v7x per-core size)


# --------------------------------------------------------------------------
# Probe: is single-buffering of grid-invariant operands supported?
# --------------------------------------------------------------------------
def _probe_kernel(x_ref, o_ref):
    o_ref[...] = x_ref[...] * 2.0


@functools.lru_cache(maxsize=None)
def _buffered_one_ok():
    try:
        spec = pl.BlockSpec((8, 128), lambda i: (0, 0),
                            pipeline_mode=pl.Buffered(1))
        f = pl.pallas_call(
            _probe_kernel,
            out_shape=jax.ShapeDtypeStruct((8, 128), jnp.float32),
            grid_spec=pltpu.PrefetchScalarGridSpec(
                num_scalar_prefetch=0, grid=(2,),
                in_specs=[spec],
                out_specs=pl.BlockSpec((8, 128), lambda i: (0, 0))))
        jax.block_until_ready(f(jnp.ones((8, 128), jnp.float32)))
        return True
    except Exception:
        return False


def _inv_spec(shape, index_map):
    """BlockSpec for a grid-invariant operand (single-buffered if possible)."""
    if _buffered_one_ok():
        return pl.BlockSpec(shape, index_map, pipeline_mode=pl.Buffered(1))
    return pl.BlockSpec(shape, index_map)


# --------------------------------------------------------------------------
# VMEM accounting (2x for row/vocab-varying blocks, 1x for invariant ones)
# --------------------------------------------------------------------------
def _vmem_logp_bytes(tm, tv, d_model, d_e, nv, has_shift):
    inv = 1 if _buffered_one_ok() else 2
    d_e_l = max(d_e, 128)
    b = 2 * tm * d_model * 2                      # x bf16, double-buffered
    b += inv * d_model * d_e_l * 2                # proj bf16, invariant
    if nv == 1:
        b += inv * tv * d_e_l * 2                 # whole W resident
        b += inv * 8 * tv * 4                     # bias (sublane padded)
    else:
        b += 2 * tv * d_e_l * 2                   # W column tile
        b += 2 * 8 * tv * 4                       # bias tile
        b += tm * d_e_l * 2                       # x_proj scratch (bf16)
        b += 2 * tm * 128 * 4                     # m, l scratch (lane padded)
    b += 2 * tm * tv * 4                          # output tile
    if has_shift:
        b += 2 * tm * 128 * 4                     # shift column (lane padded)
    return b


def _vmem_gather_bytes(tm, tv, d_model, d_e):
    inv = 1 if _buffered_one_ok() else 2
    d_e_l = max(d_e, 128)
    b = 2 * tm * d_model * 2
    b += inv * d_model * d_e_l * 2
    b += 2 * tv * d_e_l * 2
    b += 2 * 8 * tv * 4
    b += 2 * tm * 128 * 4                         # targets
    b += 2 * tm * 128 * 4                         # output column
    b += tm * d_e_l * 2 + 3 * tm * 128 * 4        # scratch
    return b


def _vmem_limit(need_bytes, cap):
    return int(min(max(int(need_bytes * 1.25), 32 * 1024 * 1024),
                   int(cap * 0.9)))


# --------------------------------------------------------------------------
# Kernel bodies
# --------------------------------------------------------------------------
def _logits_tile(xproj_bf16, w_ref, b_ref):
    # NT contraction (contract last dims of both) -- no in-kernel transpose.
    return lax.dot_general(
        xproj_bf16, w_ref[...],
        dimension_numbers=(((1,), (1,)), ((), ())),
        preferred_element_type=jnp.float32) + b_ref[...]


def _logp_simple_kernel(x_ref, proj_ref, w_ref, b_ref, *rest, has_shift):
    """Single-vocab-tile cluster: log_softmax over the whole (padded) cluster."""
    if has_shift:
        shift_ref, out_ref = rest
    else:
        (out_ref,) = rest
    xp = jnp.dot(x_ref[...], proj_ref[...], preferred_element_type=jnp.float32)
    logits = _logits_tile(xp.astype(w_ref.dtype), w_ref, b_ref)
    m = jnp.max(logits, axis=-1, keepdims=True)
    lse = m + jnp.log(jnp.sum(jnp.exp(logits - m), axis=-1, keepdims=True))
    res = logits - lse
    if has_shift:
        res = res + shift_ref[...]
    out_ref[...] = res.astype(out_ref.dtype)


def _logp_tiled_kernel(x_ref, proj_ref, w_ref, b_ref, *rest, nv, has_shift):
    """Vocab-tiled two-pass LSE: pass 1 accumulates max/sum-exp, pass 2 writes."""
    if has_shift:
        shift_ref, out_ref, xproj_sc, m_sc, l_sc = rest
    else:
        out_ref, xproj_sc, m_sc, l_sc = rest
    s = pl.program_id(1)

    @pl.when(s == 0)
    def _():
        xp = jnp.dot(x_ref[...], proj_ref[...],
                     preferred_element_type=jnp.float32)
        xproj_sc[...] = xp.astype(xproj_sc.dtype)
        m_sc[...] = jnp.full_like(m_sc, _NEG)
        l_sc[...] = jnp.zeros_like(l_sc)

    logits = _logits_tile(xproj_sc[...], w_ref, b_ref)

    @pl.when(s < nv)          # pass 1: running max / sum-exp over vocab tiles
    def _():
        m_old = m_sc[...]
        m_new = jnp.maximum(m_old, jnp.max(logits, axis=-1, keepdims=True))
        l_sc[...] = (l_sc[...] * jnp.exp(m_old - m_new)
                     + jnp.sum(jnp.exp(logits - m_new), axis=-1, keepdims=True))
        m_sc[...] = m_new

    @pl.when(s >= nv)         # pass 2: write normalized log-probs per tile
    def _():
        lse = m_sc[...] + jnp.log(l_sc[...])
        res = logits - lse
        if has_shift:
            res = res + shift_ref[...]
        out_ref[...] = res.astype(out_ref.dtype)


def _gather_kernel(rng_ref, x_ref, proj_ref, w_ref, b_ref, tgt_ref, out_ref,
                   xproj_sc, m_sc, l_sc, sel_sc):
    """Online LSE + running selected logit; skips row blocks outside [r0, r1)."""
    i = pl.program_id(0)
    v = pl.program_id(1)
    nv = pl.num_programs(1)
    tm = x_ref.shape[0]
    tv = w_ref.shape[0]
    row0 = i * tm
    active = jnp.logical_and(row0 < rng_ref[1], row0 + tm > rng_ref[0])

    @pl.when(jnp.logical_and(active, v == 0))
    def _():
        xp = jnp.dot(x_ref[...], proj_ref[...],
                     preferred_element_type=jnp.float32)
        xproj_sc[...] = xp.astype(xproj_sc.dtype)
        m_sc[...] = jnp.full_like(m_sc, _NEG)
        l_sc[...] = jnp.zeros_like(l_sc)
        sel_sc[...] = jnp.zeros_like(sel_sc)

    @pl.when(active)
    def _():
        logits = _logits_tile(xproj_sc[...], w_ref, b_ref)
        m_old = m_sc[...]
        m_new = jnp.maximum(m_old, jnp.max(logits, axis=-1, keepdims=True))
        l_sc[...] = (l_sc[...] * jnp.exp(m_old - m_new)
                     + jnp.sum(jnp.exp(logits - m_new), axis=-1, keepdims=True))
        m_sc[...] = m_new
        cols = lax.broadcasted_iota(jnp.int32, logits.shape, 1) + v * tv
        sel_sc[...] += jnp.sum(jnp.where(cols == tgt_ref[...], logits, 0.0),
                               axis=-1, keepdims=True)

    @pl.when(jnp.logical_and(v == nv - 1, active))
    def _():
        out_ref[...] = sel_sc[...] - (m_sc[...] + jnp.log(l_sc[...]))

    @pl.when(jnp.logical_and(v == nv - 1, jnp.logical_not(active)))
    def _():
        out_ref[...] = jnp.zeros_like(out_ref)


# --------------------------------------------------------------------------
# pallas_call wrappers
# --------------------------------------------------------------------------
def _logp_call(x_bf, params, *, tm, shift=None, out_dtype=jnp.float32,
               vmem_cap):
    n_pad, d_model = x_bf.shape
    w, b, proj = params['w'], params['b'], params['proj']
    vpad, d_e = w.shape
    tv, nv = params['tv'], params['nv']
    n_rt = n_pad // tm
    has_shift = shift is not None

    flops = (2 * n_pad * d_model * d_e
             + 2 * n_pad * d_e * vpad * (2 if nv > 1 else 1))
    bytes_acc = (n_pad * d_model * 2 + d_model * d_e * 2 + vpad * d_e * 2
                 + vpad * 4 + n_pad * vpad * jnp.dtype(out_dtype).itemsize
                 + (n_pad * 4 if has_shift else 0))
    cost = pl.CostEstimate(flops=int(flops),
                           transcendentals=int(n_pad * vpad),
                           bytes_accessed=int(bytes_acc))
    need = _vmem_logp_bytes(tm, tv, d_model, d_e, nv, has_shift)

    if nv == 1:
        in_specs = [
            pl.BlockSpec((tm, d_model), lambda i: (i, 0)),
            _inv_spec((d_model, d_e), lambda i: (0, 0)),
            _inv_spec((vpad, d_e), lambda i: (0, 0)),
            _inv_spec((1, vpad), lambda i: (0, 0)),
        ]
        args = [x_bf, proj, w, b]
        if has_shift:
            in_specs.append(pl.BlockSpec((tm, 1), lambda i: (i, 0)))
            args.append(shift)
        kernel = functools.partial(_logp_simple_kernel, has_shift=has_shift)
        grid = (n_rt,)
        out_spec = pl.BlockSpec((tm, vpad), lambda i: (i, 0))
        scratch = []
        dims = ("parallel",)
    else:
        def w_map(i, s):
            return (jnp.where(s < nv, s, s - nv), 0)

        def b_map(i, s):
            return (0, jnp.where(s < nv, s, s - nv))

        def o_map(i, s):
            return (i, jnp.where(s < nv, 0, s - nv))

        in_specs = [
            pl.BlockSpec((tm, d_model), lambda i, s: (i, 0)),
            _inv_spec((d_model, d_e), lambda i, s: (0, 0)),
            pl.BlockSpec((tv, d_e), w_map),
            pl.BlockSpec((1, tv), b_map),
        ]
        args = [x_bf, proj, w, b]
        if has_shift:
            in_specs.append(pl.BlockSpec((tm, 1), lambda i, s: (i, 0)))
            args.append(shift)
        kernel = functools.partial(_logp_tiled_kernel, nv=nv,
                                   has_shift=has_shift)
        grid = (n_rt, 2 * nv)
        out_spec = pl.BlockSpec((tm, tv), o_map)
        scratch = [pltpu.VMEM((tm, d_e), jnp.bfloat16),
                   pltpu.VMEM((tm, 1), jnp.float32),
                   pltpu.VMEM((tm, 1), jnp.float32)]
        dims = ("parallel", "arbitrary")

    return pl.pallas_call(
        kernel,
        out_shape=jax.ShapeDtypeStruct((n_pad, vpad), out_dtype),
        grid_spec=pltpu.PrefetchScalarGridSpec(
            num_scalar_prefetch=0, grid=grid, in_specs=in_specs,
            out_specs=out_spec, scratch_shapes=scratch),
        compiler_params=pltpu.CompilerParams(
            dimension_semantics=dims,
            vmem_limit_bytes=_vmem_limit(need, vmem_cap)),
        cost_estimate=cost,
    )(*args)


def _gather_call(rng, x_bf, params, targets, *, tm, vmem_cap):
    n_pad, d_model = x_bf.shape
    w, b, proj = params['w'], params['b'], params['proj']
    vpad, d_e = w.shape
    tv, nv = params['tv'], params['nv']
    n_rt = n_pad // tm

    def row_map(i, v, rng_ref):
        # Clamp fetches of inactive row blocks into the cluster's range so no
        # new x/target DMAs are issued for skipped blocks (always in-bounds).
        lo = jnp.minimum(rng_ref[0] // tm, n_rt - 1)
        hi = jnp.minimum(jnp.maximum(rng_ref[1] - 1, rng_ref[0]) // tm,
                         n_rt - 1)
        return (jnp.clip(i, lo, hi), 0)

    flops = 2 * n_pad * d_model * d_e + 2 * n_pad * d_e * vpad
    cost = pl.CostEstimate(
        flops=int(flops), transcendentals=int(n_pad * vpad),
        bytes_accessed=int(n_pad * d_model * 2 + d_model * d_e * 2
                           + vpad * d_e * 2 + vpad * 4 + 2 * n_pad * 4))
    need = _vmem_gather_bytes(tm, tv, d_model, d_e)

    return pl.pallas_call(
        _gather_kernel,
        out_shape=jax.ShapeDtypeStruct((n_pad, 1), jnp.float32),
        grid_spec=pltpu.PrefetchScalarGridSpec(
            num_scalar_prefetch=1,
            grid=(n_rt, nv),
            in_specs=[
                pl.BlockSpec((tm, d_model), row_map),
                _inv_spec((d_model, d_e), lambda i, v, r: (0, 0)),
                pl.BlockSpec((tv, d_e), lambda i, v, r: (v, 0)),
                pl.BlockSpec((1, tv), lambda i, v, r: (0, v)),
                pl.BlockSpec((tm, 1), row_map),
            ],
            out_specs=pl.BlockSpec((tm, 1), lambda i, v, r: (i, 0)),
            scratch_shapes=[pltpu.VMEM((tm, d_e), jnp.bfloat16),
                            pltpu.VMEM((tm, 1), jnp.float32),
                            pltpu.VMEM((tm, 1), jnp.float32),
                            pltpu.VMEM((tm, 1), jnp.float32)]),
        compiler_params=pltpu.CompilerParams(
            dimension_semantics=("parallel", "arbitrary"),
            vmem_limit_bytes=_vmem_limit(need, vmem_cap)),
        cost_estimate=cost,
    )(rng, x_bf, proj, w, b, targets)


# --------------------------------------------------------------------------
# Module: ProjectedAdaptiveLogSoftmax (JAX / Pallas)
# Config exercised: div_val=2, all tie_projs=False, keep_order=True.
# --------------------------------------------------------------------------
class ProjectedAdaptiveLogSoftmaxPallas:
    def __init__(self, vocab_size, d_embed, d_model, cutoffs, tie_projs,
                 div_val=2, keep_order=True, tm=256, tv_max=1024,
                 out_dtype=jnp.float32, key=jax.random.PRNGKey(0)):
        assert div_val != 1, "this synthetic config uses div_val > 1"
        assert not any(tie_projs), "synthetic config: all projections untied"
        self.vocab_size = vocab_size
        self.d_embed = d_embed
        self.d_model = d_model
        self.div_val = div_val
        self.keep_order = keep_order
        self.cutoffs = list(cutoffs) + [vocab_size]
        self.cutoffs_ends = [0] + self.cutoffs
        self.n_clusters = len(self.cutoffs) - 1
        self.head_size = self.cutoffs[0] + self.n_clusters
        self.tm = max(8, 1 << (max(int(tm), 8).bit_length() - 1))  # pow2 tile
        self.tv_max = max(128, _round_up(int(tv_max), 128))
        self.out_dtype = out_dtype
        self._vmem_cap = _vmem_capacity()

        keys = jax.random.split(key, 4 * len(self.cutoffs) + 2)
        ki = iter(range(len(keys)))

        self.cluster_weight = 0.02 * jax.random.normal(
            keys[next(ki)], (self.n_clusters, d_embed), jnp.float32)
        self.cluster_bias = 0.02 * jax.random.normal(
            keys[next(ki)], (self.n_clusters,), jnp.float32)

        self.out_projs, self.out_weights, self.out_biases = [], [], []
        for i in range(len(self.cutoffs)):
            c_start, c_end = self.cutoffs_ends[i], self.cutoffs_ends[i + 1]
            d_embed_i = d_embed // (div_val ** i)
            self.out_projs.append(0.02 * jax.random.normal(
                keys[next(ki)], (d_model, d_embed_i), jnp.float32))
            self.out_weights.append(0.02 * jax.random.normal(
                keys[next(ki)], (c_end - c_start, d_embed_i), jnp.float32))
            self.out_biases.append(0.02 * jax.random.normal(
                keys[next(ki)], (c_end - c_start,), jnp.float32))

        self._prepare_kernel_params()

    # One-time prep: bf16 casts, vocab padding, per-cluster vocab tile choice
    # driven by the exact per-buffer VMEM estimate.
    def _prepare_kernel_params(self):
        budget = int(0.75 * self._vmem_cap)

        def make(proj, w, b, has_shift):
            v, d_e = w.shape
            tv = min(self.tv_max, _round_up(v, 128))
            while True:
                vpad = _round_up(v, tv)
                nv = vpad // tv
                if (tv <= 128 or _vmem_logp_bytes(self.tm, tv, self.d_model,
                                                  d_e, nv, has_shift)
                        <= budget):
                    break
                tv = max(128, (tv // 2) // 128 * 128)
            vpad = _round_up(v, tv)
            nv = vpad // tv
            w_p = jnp.pad(w, ((0, vpad - v), (0, 0))).astype(jnp.bfloat16)
            b_p = jnp.pad(b.astype(jnp.float32), (0, vpad - v),
                          constant_values=_NEG).reshape(1, vpad)
            return dict(proj=proj.astype(jnp.bfloat16), w=w_p, b=b_p,
                        v=v, vpad=vpad, tv=tv, nv=nv, d_e=d_e)

        head_w = jnp.concatenate([self.out_weights[0], self.cluster_weight], 0)
        head_b = jnp.concatenate([self.out_biases[0], self.cluster_bias], 0)
        self.head_params = make(self.out_projs[0], head_w, head_b, False)
        self.tail_params = [
            make(self.out_projs[i], self.out_weights[i], self.out_biases[i],
                 True)
            for i in range(1, len(self.cutoffs))]

    def _tile_rows(self, n):
        tm = min(self.tm, max(8, _next_pow2(n)))
        n_pad = _round_up(n, tm)
        return tm, n_pad

    # Inference path: full (N, vocab) log-probs, cluster by cluster.
    def _full_log_probs(self, x2d):
        n = x2d.shape[0]
        tm, n_pad = self._tile_rows(n)
        x_bf = jnp.pad(x2d, ((0, n_pad - n), (0, 0))).astype(jnp.bfloat16)
        c0 = self.cutoffs[0]

        head = _logp_call(x_bf, self.head_params, tm=tm,
                          out_dtype=self.out_dtype, vmem_cap=self._vmem_cap)
        chunks = [head[:n, :c0].astype(jnp.float32)]
        for i in range(1, len(self.cutoffs)):
            # Only the needed head-cluster column, (n_pad, 1).
            shift = head[:, c0 + i - 1:c0 + i].astype(jnp.float32)
            p = self.tail_params[i - 1]
            t = _logp_call(x_bf, p, tm=tm, shift=shift,
                           out_dtype=self.out_dtype, vmem_cap=self._vmem_cap)
            chunks.append(t[:n, :p['v']].astype(jnp.float32))
        # TODO(synk): write each cluster slab directly into one shared output
        # via input_output_aliases + column-offset out_specs to drop this concat.
        return jnp.concatenate(chunks, axis=1)

    # Training path: per-token NLL; rows sorted by cluster so each tail only
    # computes on its own row blocks (block-skip via scalar-prefetched ranges).
    def _nll(self, x2d, lab):
        n = x2d.shape[0]
        tm, n_pad = self._tile_rows(n)
        c0 = self.cutoffs[0]
        lab = lab.astype(jnp.int32)
        cluster_id = jnp.searchsorted(
            jnp.asarray(self.cutoffs, dtype=jnp.int32), lab,
            side='right').astype(jnp.int32)

        order = jnp.argsort(cluster_id)
        inv_order = jnp.argsort(order)
        x_s = x2d[order]
        lab_s = lab[order]
        cid_s = cluster_id[order]

        x_bf = jnp.pad(x_s, ((0, n_pad - n), (0, 0))).astype(jnp.bfloat16)
        lab_p = jnp.pad(lab_s, (0, n_pad - n))
        cid_p = jnp.pad(cid_s, (0, n_pad - n))

        # Head: every row gathers either its word log-prob or its cluster logit.
        head_tgt = jnp.where(cid_p == 0, lab_p,
                             c0 + cid_p - 1).astype(jnp.int32)[:, None]
        full_rng = jnp.array([0, n_pad], dtype=jnp.int32)
        total = _gather_call(full_rng, x_bf, self.head_params, head_tgt,
                             tm=tm, vmem_cap=self._vmem_cap)[:, 0]

        for i in range(1, len(self.cutoffs)):
            start_v = self.cutoffs_ends[i]
            local = (lab_p - start_v).astype(jnp.int32)[:, None]
            r0 = jnp.searchsorted(cid_s, i, side='left').astype(jnp.int32)
            r1 = jnp.searchsorted(cid_s, i, side='right').astype(jnp.int32)
            rng = jnp.stack([r0, r1]).astype(jnp.int32)
            sel = _gather_call(rng, x_bf, self.tail_params[i - 1], local,
                               tm=tm, vmem_cap=self._vmem_cap)[:, 0]
            total = total + jnp.where(cid_p == i, sel, 0.0)

        nll_sorted = -total[:n]
        return nll_sorted[inv_order]          # keep_order=True row order

    def __call__(self, inputs, labels=None):
        if labels is not None:
            inputs = inputs[..., :-1, :]
            labels = labels[..., 1:]
            x2d = inputs.reshape(-1, inputs.shape[-1])
            lab = labels.reshape(-1)
            return self._nll(x2d, lab)
        x2d = inputs.reshape(-1, inputs.shape[-1])
        return self._full_log_probs(x2d)


# --------------------------------------------------------------------------
# Pure-JAX reference (same bf16 matmul path) for correctness checking
# --------------------------------------------------------------------------
def reference_log_probs(module, x2d):
    x_bf = x2d.astype(jnp.bfloat16)

    def logp(p):
        xp = jnp.dot(x_bf, p['proj'], preferred_element_type=jnp.float32)
        logits = jnp.dot(xp.astype(jnp.bfloat16), p['w'].T,
                         preferred_element_type=jnp.float32) + p['b']
        return jax.nn.log_softmax(logits, axis=-1)

    c0 = module.cutoffs[0]
    head = logp(module.head_params)
    chunks = [head[:, :c0]]
    for i in range(1, len(module.cutoffs)):
        p = module.tail_params[i - 1]
        tl = logp(p)
        chunks.append(head[:, c0 + i - 1:c0 + i] + tl[:, :p['v']])
    return jnp.concatenate(chunks, axis=1)


if __name__ == "__main__":
    # Small shapes consistent with the module's forward.
    vocab_size, d_embed, d_model = 320, 64, 64
    cutoffs = [128, 256]                 # clusters [0,128), [128,256), [256,320)
    tie_projs = (False, False, False)
    batch, seq = 2, 8

    key = jax.random.PRNGKey(0)
    k_in, k_lab, k_par = jax.random.split(key, 3)
    inputs = jax.random.normal(k_in, (batch, seq, d_model), jnp.float32)
    labels = jax.random.randint(k_lab, (batch, seq), 0, vocab_size)

    # tv_max=128 forces the head cluster (130 -> 256 padded cols) onto the
    # vocab-tiled two-pass / online-LSE path so it is exercised even at these
    # small shapes; the tails exercise the single-tile path.
    module = ProjectedAdaptiveLogSoftmaxPallas(
        vocab_size, d_embed, d_model, cutoffs, tie_projs,
        div_val=2, keep_order=True, tm=256, tv_max=128, key=k_par)

    # Inference path: full (N, vocab) log-probs.
    out_logp = jax.block_until_ready(module(inputs))
    # Training path: per-token NLL without materializing the full matrix.
    out_nll = jax.block_until_ready(module(inputs, labels))

    assert out_logp.shape == (batch * seq, vocab_size)
    assert out_nll.shape == (batch * (seq - 1),)

    # Correctness vs pure-JAX reference (same bf16 matmul path).
    x2d = inputs.reshape(-1, d_model)
    ref = reference_log_probs(module, x2d)
    err = float(jnp.max(jnp.abs(out_logp - ref)))
    assert jnp.allclose(out_logp, ref, atol=3e-3, rtol=3e-3), err
    # Rows should sum to ~1 over the full vocab.
    assert jnp.allclose(jnp.sum(jnp.exp(out_logp), axis=-1), 1.0, atol=5e-3)

    # Labels path vs gather from the reference on the shifted inputs.
    x2d_s = inputs[:, :-1, :].reshape(-1, d_model)
    lab_s = labels[:, 1:].reshape(-1)
    ref_s = reference_log_probs(module, x2d_s)
    ref_nll = -jnp.take_along_axis(ref_s, lab_s[:, None], axis=1)[:, 0]
    err2 = float(jnp.max(jnp.abs(out_nll - ref_nll)))
    assert jnp.allclose(out_nll, ref_nll, atol=3e-3, rtol=3e-3), err2

    print("KERNEL_OK")
</pallas_src>

<mosaic_0001>
module attributes {stable_mosaic.version = 11 : i64} {
  func.func @_probe_kernel(%arg0: i32, %arg1: memref<8x128xf32, #tpu.memory_space<vmem>>, %arg2: memref<8x128xf32, #tpu.memory_space<vmem>>) attributes {dimension_semantics = [#tpu.dimension_semantics<arbitrary>], iteration_bounds = array<i64: 2>, scalar_prefetch = 0 : i64, scratch_operands = 0 : i64, tpu.core_type = #tpu.core_type<tc>, window_params = [{pipeline_mode = #tpu.pipeline_mode<synchronous>, transform_indices = @transform_0, window_bounds = array<i64: 8, 128>}, {pipeline_mode = #tpu.pipeline_mode<synchronous>, transform_indices = @transform_1, window_bounds = array<i64: 8, 128>}]} {
    %c0 = arith.constant 0 : index
    %c0_0 = arith.constant 0 : index
    %0 = vector.load %arg1[%c0, %c0_0] : memref<8x128xf32, #tpu.memory_space<vmem>>, vector<8x128xf32>
    %cst = arith.constant 2.000000e+00 : f32
    %1 = vector.broadcast %cst : f32 to vector<8x128xf32>
    %2 = arith.mulf %0, %1 : vector<8x128xf32>
    %c0_1 = arith.constant 0 : index
    %c0_2 = arith.constant 0 : index
    %3 = vector.load %arg2[%c0_1, %c0_2] : memref<8x128xf32, #tpu.memory_space<vmem>>, vector<8x128xf32>
    tpu.vector_store %arg2[%c0_1, %c0_2], %2 {strides = array<i32>} : memref<8x128xf32, #tpu.memory_space<vmem>>, vector<8x128xf32>,
    return
  }
  func.func @transform_0(%arg0: i32) -> (i32, i32) {
    %c0_i32 = arith.constant 0 : i32
    %c0_i32_0 = arith.constant 0 : i32
    %c0_i32_1 = arith.constant 0 : i32
    return %c0_i32, %c0_i32_0 : i32, i32
  }
  func.func @transform_1(%arg0: i32) -> (i32, i32) {
    %c0_i32 = arith.constant 0 : i32
    %c0_i32_0 = arith.constant 0 : i32
    %c0_i32_1 = arith.constant 0 : i32
    return %c0_i32, %c0_i32_0 : i32, i32
  }
}

module attributes {stable_mosaic.version = 11 : i64} {
  func.func @_logp_tiled_kernel(%arg0: i32, %arg1: i32, %arg2: memref<16x64xbf16, #tpu.memory_space<vmem>>, %arg3: memref<64x64xbf16, #tpu.memory_space<vmem>>, %arg4: memref<128x64xbf16, #tpu.memory_space<vmem>>, %arg5: memref<1x128xf32, #tpu.memory_space<vmem>>, %arg6: memref<16x128xf32, #tpu.memory_space<vmem>>, %arg7: memref<16x64xbf16, #tpu.memory_space<vmem>>, %arg8: memref<16x1xf32, #tpu.memory_space<vmem>>, %arg9: memref<16x1xf32, #tpu.memory_space<vmem>>) attributes {dimension_semantics = [#tpu.dimension_semantics<parallel>, #tpu.dimension_semantics<arbitrary>], iteration_bounds = array<i64: 1, 4>, scalar_prefetch = 0 : i64, scratch_operands = 3 : i64, tpu.core_type = #tpu.core_type<tc>, window_params = [{transform_indices = @transform_0, window_bounds = array<i64: 16, 64>}, {pipeline_mode = #tpu.pipeline_mode<synchronous>, transform_indices = @transform_1, window_bounds = array<i64: 64, 64>}, {transform_indices = @transform_2, window_bounds = array<i64: 128, 64>}, {transform_indices = @transform_3, window_bounds = array<i64: 1, 128>}, {transform_indices = @transform_4, window_bounds = array<i64: 16, 128>}]} {
    %c0_i32 = arith.constant 0 : i32
    %0 = arith.cmpi eq, %arg1, %c0_i32 : i32
    %1 = arith.extui %0 : i1 to i32
    %c0_i32_0 = arith.constant 0 : i32
    %2 = arith.cmpi ne, %1, %c0_i32_0 : i32
    scf.if %2 {
      %c0_9 = arith.constant 0 : index
      %c0_10 = arith.constant 0 : index
      %15 = vector.load %arg2[%c0_9, %c0_10] : memref<16x64xbf16, #tpu.memory_space<vmem>>, vector<16x64xbf16>
      %c0_11 = arith.constant 0 : index
      %c0_12 = arith.constant 0 : index
      %16 = vector.load %arg3[%c0_11, %c0_12] : memref<64x64xbf16, #tpu.memory_space<vmem>>, vector<64x64xbf16>
      %cst_13 = arith.constant dense<0.000000e+00> : vector<16x64xf32>
      %17 = tpu.matmul %15, %16, %cst_13 {dimension_numbers = #tpu.dot_dimension_numbers<[1], [0], [0], [1], [0, 0, 1, 1], [], []>} : vector<16x64xbf16>, vector<64x64xbf16>, vector<16x64xf32> -> vector<16x64xf32>
      %18 = arith.truncf %17 : vector<16x64xf32> to vector<16x64xbf16>
      %c0_14 = arith.constant 0 : index
      %c0_15 = arith.constant 0 : index
      %19 = vector.load %arg7[%c0_14, %c0_15] : memref<16x64xbf16, #tpu.memory_space<vmem>>, vector<16x64xbf16>
      tpu.vector_store %arg7[%c0_14, %c0_15], %18 {strides = array<i32>} : memref<16x64xbf16, #tpu.memory_space<vmem>>, vector<16x64xbf16>,
      %cst_16 = arith.constant -1.000000e+30 : f32
      %20 = vector.broadcast %cst_16 : f32 to vector<16x1xf32>
      %c0_17 = arith.constant 0 : index
      %c0_18 = arith.constant 0 : index
      %21 = vector.load %arg8[%c0_17, %c0_18] : memref<16x1xf32, #tpu.memory_space<vmem>>, vector<16x1xf32>
      tpu.vector_store %arg8[%c0_17, %c0_18], %20 {strides = array<i32>} : memref<16x1xf32, #tpu.memory_space<vmem>>, vector<16x1xf32>,
      %cst_19 = arith.constant 0.000000e+00 : f32
      %22 = vector.broadcast %cst_19 : f32 to vector<16x1xf32>
      %c0_20 = arith.constant 0 : index
      %c0_21 = arith.constant 0 : index
      %23 = vector.load %arg9[%c0_20, %c0_21] : memref<16x1xf32, #tpu.memory_space<vmem>>, vector<16x1xf32>
      tpu.vector_store %arg9[%c0_20, %c0_21], %22 {strides = array<i32>} : memref<16x1xf32, #tpu.memory_space<vmem>>, vector<16x1xf32>,
    } else {
    }
    %c0 = arith.constant 0 : index
    %c0_1 = arith.constant 0 : index
    %3 = vector.load %arg7[%c0, %c0_1] : memref<16x64xbf16, #tpu.memory_space<vmem>>, vector<16x64xbf16>
    %c0_2 = arith.constant 0 : index
    %c0_3 = arith.constant 0 : index
    %4 = vector.load %arg4[%c0_2, %c0_3] : memref<128x64xbf16, #tpu.memory_space<vmem>>, vector<128x64xbf16>
    %cst = arith.constant dense<0.000000e+00> : vector<16x128xf32>
    %5 = tpu.matmul %3, %4, %cst {dimension_numbers = #tpu.dot_dimension_numbers<[1], [1], [0], [0], [0, 0, 1, 0], [], []>} : vector<16x64xbf16>, vector<128x64xbf16>, vector<16x128xf32> -> vector<16x128xf32>
    %c0_4 = arith.constant 0 : index
    %c0_5 = arith.constant 0 : index
    %6 = vector.load %arg5[%c0_4, %c0_5] : memref<1x128xf32, #tpu.memory_space<vmem>>, vector<1x128xf32>
    %7 = vector.broadcast %6 : vector<1x128xf32> to vector<16x128xf32>
    %8 = arith.addf %5, %7 : vector<16x128xf32>
    %c2_i32 = arith.constant 2 : i32
    %9 = arith.cmpi slt, %arg1, %c2_i32 : i32
    %10 = arith.extui %9 : i1 to i32
    %c0_i32_6 = arith.constant 0 : i32
    %11 = arith.cmpi ne, %10, %c0_i32_6 : i32
    scf.if %11 {
      %c0_9 = arith.constant 0 : index
      %c0_10 = arith.constant 0 : index
      %15 = vector.load %arg8[%c0_9, %c0_10] : memref<16x1xf32, #tpu.memory_space<vmem>>, vector<16x1xf32>
      %cst_11 = arith.constant dense<0xFF800000> : vector<16xf32>
      %16 = vector.multi_reduction <maximumf>, %8, %cst_11 [1] : vector<16x128xf32> to vector<16xf32>
      %17 = vector.shape_cast %16 : vector<16xf32> to vector<16x1xf32>
      %18 = arith.maximumf %15, %17 : vector<16x1xf32>
      %c0_12 = arith.constant 0 : index
      %c0_13 = arith.constant 0 : index
      %19 = vector.load %arg9[%c0_12, %c0_13] : memref<16x1xf32, #tpu.memory_space<vmem>>, vector<16x1xf32>
      %20 = arith.subf %15, %18 : vector<16x1xf32>
      %21 = math.exp %20 : vector<16x1xf32>
      %22 = arith.mulf %19, %21 : vector<16x1xf32>
      %23 = vector.broadcast %18 : vector<16x1xf32> to vector<16x128xf32>
      %24 = arith.subf %8, %23 : vector<16x128xf32>
      %25 = math.exp %24 : vector<16x128xf32>
      %cst_14 = arith.constant dense<0.000000e+00> : vector<16xf32>
      %26 = vector.multi_reduction <add>, %25, %cst_14 [1] : vector<16x128xf32> to vector<16xf32>
      %27 = vector.shape_cast %26 : vector<16xf32> to vector<16x1xf32>
      %28 = arith.addf %22, %27 : vector<16x1xf32>
      %c0_15 = arith.constant 0 : index
      %c0_16 = arith.constant 0 : index
      %29 = vector.load %arg9[%c0_15, %c0_16] : memref<16x1xf32, #tpu.memory_space<vmem>>, vector<16x1xf32>
      tpu.vector_store %arg9[%c0_15, %c0_16], %28 {strides = array<i32>} : memref<16x1xf32, #tpu.memory_space<vmem>>, vector<16x1xf32>,
      %c0_17 = arith.constant 0 : index
      %c0_18 = arith.constant 0 : index
      %30 = vector.load %arg8[%c0_17, %c0_18] : memref<16x1xf32, #tpu.memory_space<vmem>>, vector<16x1xf32>
      tpu.vector_store %arg8[%c0_17, %c0_18], %18 {strides = array<i32>} : memref<16x1xf32, #tpu.memory_space<vmem>>, vector<16x1xf32>,
    } else {
    }
    %c2_i32_7 = arith.constant 2 : i32
    %12 = arith.cmpi sge, %arg1, %c2_i32_7 : i32
    %13 = arith.extui %12 : i1 to i32
    %c0_i32_8 = arith.constant 0 : i32
    %14 = arith.cmpi ne, %13, %c0_i32_8 : i32
    scf.if %14 {
      %c0_9 = arith.constant 0 : index
      %c0_10 = arith.constant 0 : index
      %15 = vector.load %arg8[%c0_9, %c0_10] : memref<16x1xf32, #tpu.memory_space<vmem>>, vector<16x1xf32>
      %c0_11 = arith.constant 0 : index
      %c0_12 = arith.constant 0 : index
      %16 = vector.load %arg9[%c0_11, %c0_12] : memref<16x1xf32, #tpu.memory_space<vmem>>, vector<16x1xf32>
      %17 = math.log %16 : vector<16x1xf32>
      %18 = arith.addf %15, %17 : vector<16x1xf32>
      %19 = vector.broadcast %18 : vector<16x1xf32> to vector<16x128xf32>
      %20 = arith.subf %8, %19 : vector<16x128xf32>
      %c0_13 = arith.constant 0 : index
      %c0_14 = arith.constant 0 : index
      %21 = vector.load %arg6[%c0_13, %c0_14] : memref<16x128xf32, #tpu.memory_space<vmem>>, vector<16x128xf32>
      tpu.vector_store %arg6[%c0_13, %c0_14], %20 {strides = array<i32>} : memref<16x128xf32, #tpu.memory_space<vmem>>, vector<16x128xf32>,
    } else {
    }
    return
  }
  func.func @transform_0(%arg0: i32, %arg1: i32) -> (i32, i32) {
    %c0_i32 = arith.constant 0 : i32
    %c0_i32_0 = arith.constant 0 : i32
    return %arg0, %c0_i32 : i32, i32
  }
  func.func @transform_1(%arg0: i32, %arg1: i32) -> (i32, i32) {
    %c0_i32 = arith.constant 0 : i32
    %c0_i32_0 = arith.constant 0 : i32
    %c0_i32_1 = arith.constant 0 : i32
    return %c0_i32, %c0_i32_0 : i32, i32
  }
  func.func @transform_2(%arg0: i32, %arg1: i32) -> (i32, i32) {
    %c2_i32 = arith.constant 2 : i32
    %0 = arith.cmpi slt, %arg1, %c2_i32 : i32
    %c2_i32_0 = arith.constant 2 : i32
    %1 = arith.subi %arg1, %c2_i32_0 : i32
    %2 = arith.select %0, %arg1, %1 : i32
    %c0_i32 = arith.constant 0 : i32
    %c0_i32_1 = arith.constant 0 : i32
    return %2, %c0_i32 : i32, i32
  }
  func.func @transform_3(%arg0: i32, %arg1: i32) -> (i32, i32) {
    %c2_i32 = arith.constant 2 : i32
    %0 = arith.cmpi slt, %arg1, %c2_i32 : i32
    %c2_i32_0 = arith.constant 2 : i32
    %1 = arith.subi %arg1, %c2_i32_0 : i32
    %2 = arith.select %0, %arg1, %1 : i32
    %c0_i32 = arith.constant 0 : i32
    %c0_i32_1 = arith.constant 0 : i32
    return %c0_i32, %2 : i32, i32
  }
  func.func @transform_4(%arg0: i32, %arg1: i32) -> (i32, i32) {
    %c2_i32 = arith.constant 2 : i32
    %0 = arith.cmpi slt, %arg1, %c2_i32 : i32
    %c2_i32_0 = arith.constant 2 : i32
    %1 = arith.subi %arg1, %c2_i32_0 : i32
    %c0_i32 = arith.constant 0 : i32
    %2 = arith.select %0, %c0_i32, %1 : i32
    %c0_i32_1 = arith.constant 0 : i32
    return %arg0, %2 : i32, i32
  }
}

</mosaic_0001>

<bundles_post_ra>
// kernel: tpu_custom_call.1
= control target key start
LH: loop header
LB: loop body
LE: loop exit
PB: predicated region body
PF: predicated region fallthrough
CT: control target
= control target key end

     0   :  { %6 = vsyncpa [#allocation3], 0  ;;  %s341_s0 = inlined_call_operand.hbm [shape: f32[8,128], index: 0, kind: input, shape index: {}]   ;;  %s342_s1 = inlined_call_operand.hbm [shape: f32[8,128], index: 1, kind: output, shape index: {}]  }
   0x1   :  { %7 = vsyncpa [#allocation4], 0  ;;  %s262_s6 = smov 0  }
   0x2 LB: > { %s145_s7 = sadd.s32 4294967295, %s248_s6   ;;  %p146_p0 = scmp.ge.s32.totalorder %s248_s6, 1  ;;  %s248_s6 = sphi %s262_s6, %s13_s6  }
   0x3   : > { %p60_p1 = scmp.lt.s32.totalorder %s248_s6, 3  ;;  %p276_p3 = scmp.eq.s32.totalorder %s145_s7, 0 }
   0x4   : > { %s250_s10 = smov [#allocation2]   ;;  %s180_s15 = scalar_lea.hbm %s341_s0, 128 }
   0x5   : > { %p270_p2 = pnand %p146_p0, %p60_p1  ;;  %s73_s11 = sshll.u32 %s250_s10, 4  ;;  %s74_s11 = int_to_ptr.vmem [resolvable:$true] %s73_s11 }
   0x6   : > { %s347_s9 = scalar_select %p276_p3, 1, 0 }
   0x7   : > { %s346_s8 = scalar_select %p270_p2, 1, 0 }
   0x8   : > { %p162_p4 = pneg %p270_p2  ;;  %p181_p6 = scmp.ne.s32.totalorder %s341_s0, %s180_s15 }
   0x9   : > { %p187_p10 = scmp.lt.u32.totalorder %s180_s15, %s341_s0 }
   0xa   : > { %p284_p5 = pnand %p276_p3, %p162_p4 }
   0xc   : > { %p182_p7 = pneg %p284_p5 }
   0xe   : > { %p183_p8 = pnand %p182_p7, %p181_p6 }
  0x10   : > { %p184_p9 = pneg %p183_p8 }
  0x12   : > { %p189_p11 = pnand %p187_p10, %p184_p9 }
  0x14   : > { %192 = shalt.err (!%p189_p11)
}
  0x15   : > { %s193_s20 = scalar_lea.vmem %s74_s11, 128  ;;  %p201_p1 = scmp.lt.s32.totalorder %s74_s11, %s74_s11 }
  0x16   : > { %p194_p12 = scmp.ne.s32.totalorder %s74_s11, %s193_s20  ;;  %p202_p4 = scmp.lt.s32.totalorder %s193_s20, %s193_s20 }
  0x18   : > { %p196_p13 = pnand %p194_p12, %p182_p7  ;;  %p203_p3 = por %p202_p4, %p201_p1 }
  0x1a   : > { %p197_p0 = pneg %p196_p13 }
  0x1c   : > { %p204_p2 = pnand %p203_p3, %p197_p0 }
  0x1e   : > { %207 = shalt.err (!%p204_p2)
}
  0x1f   : > { %165 = dma.hbm_to_vmem [thread:$0]  (!%p284_p5), %s341_s0, 128, %s74_s11, [#allocation3]  }
  0x20   : > { %p349_p6 = scmp.ne.s32.totalorder %s346_s8, 0 }
  0x21   : > { %p350_p8 = scmp.ne.s32.totalorder (!%p349_p6), %s347_s9, 0 }
  0x22   : > { %86 = sbr.rel (%p349_p6) target bundleno = 67 (0x43), region = 24 }
  0x29   : > { %239 = dma.done.wait (%p350_p8), [#allocation3], 128  }
  0x2a   : > { %241 = vsyncadd (%p350_p8), [#allocation3], 4294967168  ;;  %s251_s23 = smov [#allocation5]   ;;  %v96_v0 = vld [vmem:[#allocation2] sm:$0xff]  ;;  %p312_p2 = scmp.eq.s32.totalorder %s145_s7, 1 }
  0x2b   : > { %s106_s24 = sshll.u32 %s251_s23, 4  ;;  %v97_v1 = vmul.f32 2.0, %v96_v0  ;;  %s107_s24 = int_to_ptr.vmem [resolvable:$true] %s106_s24 }
  0x2c   : > { %s208_s26 = scalar_lea.vmem %s107_s24, 128  ;;  %p215_p9 = scmp.lt.s32.totalorder %s107_s24, %s107_s24 }
  0x2d   : > { %98 = vst [vmem:[#allocation5] sm:$0xff] %v97_v1  ;;  %p209_p3 = scmp.ne.s32.totalorder %s107_s24, %s208_s26  ;;  %p216_p10 = scmp.lt.s32.totalorder %s208_s26, %s208_s26 }
  0x2f   : > { %p210_p5 = pnand %p209_p3, %p312_p2  ;;  %p217_p11 = por %p216_p10, %p215_p9 }
  0x31   : > { %p211_p7 = pneg %p210_p5 }
  0x33   : > { %p218_p12 = pnand %p217_p11, %p211_p7 }
  0x35   : > { %221 = shalt.err (!%p218_p12)
}
  0x36   : > { %s222_s29 = scalar_lea.hbm %s342_s1, 128 }
  0x37   : > { %p223_p13 = scmp.ne.s32.totalorder %s342_s1, %s222_s29  ;;  %p228_p4 = scmp.lt.u32.totalorder %s222_s29, %s342_s1 }
  0x39   : > { %p224_p0 = pnand %p223_p13, %p312_p2 }
  0x3b   : > { %p225_p1 = pneg %p224_p0 }
  0x3d   : > { %p230_p6 = pnand %p228_p4, %p225_p1 }
  0x3f   : > { %233 = shalt.err (!%p230_p6)
}
  0x40   : > { %159 = dma.vmem_to_hbm [thread:$0]  (%p312_p2), %s107_s24, 128, %s342_s1, [#allocation4]  }
  0x41   : > { %243 = dma.done.wait (%p312_p2), [#allocation4], 128  }
  0x42   : > { %245 = vsyncadd (%p312_p2), [#allocation4], 4294967168 }
  0x43 PF: > { %s13_s6 = sadd.s32 1, %s248_s6  }
  0x44   : > { %p10_p8 = scmp.ge.s32.totalorder %s13_s6, 4  }
  0x46   :  { %12 = sbr.rel (!%p10_p8) target bundleno = 2 (0x2), region = 53 }
  0x4d   :  { %119 = vsyncpa [#allocation3], 1 }
  0x4e   :  { %121 = vsyncpa [#allocation3 + $0x1], 1 }
  0x4f   :  { %122 = vsyncpa [#allocation4], 1 }
  0x50   :  { %124 = vsyncpa [#allocation4 + $0x1], 1 }

// kernel: tpu_custom_call.1
= control target key start
LH: loop header
LB: loop body
LE: loop exit
PB: predicated region body
PF: predicated region fallthrough
CT: control target
= control target key end

     0   :  { %9 = vsyncpa [#allocation6], 0  ;;  %s1214_s0 = inlined_call_operand.vmem [shape: bf16[16,64], index: 0, kind: input, shape index: {}]   ;;  %s1215_s1 = inlined_call_operand.vmem [shape: bf16[64,64], index: 1, kind: input, shape index: {}]   ;;  %s1216_s2 = inlined_call_operand.vmem [shape: bf16[256,64], index: 2, kind: input, shape index: {}]   ;;  %s1217_s3 = inlined_call_operand.vmem [shape: f32[1,256], index: 3, kind: input, shape index: {}]   ;;  %s1218_s4 = inlined_call_operand.hbm [shape: f32[16,256], index: 4, kind: output, shape index: {}]  }
   0x1   :  { %11 = vsyncpa [#allocation6 + $0x1], 0  ;;  %s1017_s15 = smov 0   ;;  %s1019_s16 = smov 0  }
   0x2   :  { %s1021_s17 = smov 0   ;;  %s1023_s18 = smov 0  }
   0x3   :  { %s1025_s19 = smov 0   ;;  %s1027_s20 = smov 0  }
   0x4 LB: > { %s721_s21 = sadd.s32 4294967295, %s979_s20   ;;  %s722_s22 = sadd.s32 4294967294, %s979_s20   ;;  %s979_s20 = sphi %s1027_s20, %s17_s20   ;;  %s975_s19 = sphi %s1025_s19, %s1225_s19   ;;  %s971_s18 = sphi %s1023_s18, %s1224_s18   ;;  %s967_s17 = sphi %s1021_s17, %s1223_s17   ;;  %s963_s16 = sphi %s1019_s16, %s1222_s16   ;;  %s959_s15 = sphi %s1017_s15, %s1221_s15  }
   0x5   : > { %s26_s23 = sadd.s32 1, %s975_s19  ;;  %p144_p0 = scmp.lt.s32.totalorder %s975_s19, 2 }
   0x6   : > { %p27_p1 = scmp.ge.s32.totalorder %s26_s23, 4  ;;  %s727_s24 = sadd.s32 4294967294, %s975_s19 }
   0x7   : > { %s1227_s24 = smov (%p144_p0, %s727_s24), 0  ;;  %s155_s25 = sadd.s32 1, %s967_s17 }
   0x8   : > { %s1229_s23 = smov (%p27_p1, %s26_s23), 0  ;;  %p165_p2 = scmp.ne.s32.totalorder %s967_s17, %s963_s16 }
   0x9   : > { %p147_p3 = scmp.lt.s32.totalorder %s1229_s23, 2  ;;  %s728_s26 = sadd.s32 4294967294, %s1229_s23 }
   0xa   : > { %p166_p4 = scmp.eq.s32.totalorder %s721_s21, 3  ;;  %p171_p5 = scmp.ne.s32.totalorder %s963_s16, %s959_s15 }
   0xb   : > { %s1231_s26 = smov (%p147_p3, %s728_s26), 0  ;;  %p172_p7 = scmp.eq.s32.totalorder %s722_s22, 3 }
   0xc   : > { %p1061_p6 = por %p166_p4, %p165_p2  ;;  %s151_s28 = ssub.s32 %s1227_s24, %s1231_s26 }
   0xd   : > { %p732_p8 = scmp.ge.s32.totalorder %s979_s20, 1  ;;  %p153_p9 = scmp.eq.s32.totalorder %s151_s28, 0 }
   0xe   : > { %p1066_p10 = por %p172_p7, %p171_p5  ;;  %p229_p11 = scmp.lt.s32.totalorder %s979_s20, 5 }
   0xf   : > { %s1072_s30 = scalar_select %p153_p9, %s967_s17, %s155_s25  }
  0x10   : > { %p230_p12 = pnand %p732_p8, %p229_p11 }
  0x11   : > { %s266_s5 = sand.u32 (!%p230_p12), 1, %s963_s16   ;;  %p275_p13 = scmp.lt.s32.totalorder (!%p230_p12), %s971_s18, 2 }
  0x12   : > { %233 = sbr.rel (%p230_p12) target bundleno = 1155 (0x483), region = 36  ;;  %s733_s6 = sshll.u32 (!%p230_p12), %s266_s5, 4 }
  0x13   : > { %s734_s7 = sadd.s32 (!%p230_p12), 4294967294, %s971_s18  ;;  %s1095_s24 = scalar_lea.vmem (!%p230_p12), [#allocation5], %s733_s6 }
  0x14   : > { %p738_p2 = scmp.ne.s32.totalorder (!%p230_p12), %s971_s18, 0 }
  0x19   : > { %s277_s8 = scalar_select %p275_p13, %s971_s18, %s734_s7 }
  0x1a   : > { %304 = sbr.rel (%p738_p2) target bundleno = 260 (0x104), region = 40  ;;  %vm391_vm0 = vcmask (!%p738_p2), 7168   ;;  %v981_v0 = vmov (!%p738_p2), 0.0   ;;  %v982_v1 = vmov (!%p738_p2), -1e+30   ;;  %v873_v2 = vld [vmem:[%s1215_s1] sm:$0xff] (!%p738_p2)  }
  0x1b   : > { %s735_s9 = sshll.u32 %s277_s8, 4  ;;  %p290_p0 = scmp.lt.s32.totalorder %s277_s8, 1  ;;  %776 = vmatprep.subr.bf16.mxu0 (!%p738_p2), %v981_v0  ;;  %392 = vst.msk [vmem:[#allocation3] sm:$0xff] (!%p738_p2), %vm391_vm0, %v982_v1  ;;  %393 = vst.msk [vmem:[#allocation3 + $0x8] sm:$0xff] (!%p738_p2), %vm391_vm0, %v982_v1  ;;  %vm983_vm1 = vmmov (!%p738_p2), 0   ;;  %v874_v3 = vld [vmem:[%s1215_s1 + $0x8] sm:$0xff] (!%p738_p2)  }
  0x1c   : > { %p279_p1 = scmp.lt.s32.totalorder %s735_s9, 31  ;;  %394 = vst.msk [vmem:[#allocation4] sm:$0xff] (!%p738_p2), %vm391_vm0, %v981_v0  ;;  %395 = vst.msk [vmem:[#allocation4 + $0x8] sm:$0xff] (!%p738_p2), %vm391_vm0, %v981_v0  ;;  %784 = vmatprep.mubr.msk.bf16.mxu0 (!%p738_p2), %vm983_vm1, %v981_v0  ;;  %777 = vmatpush3.bf16.msra.mxu0 (!%p738_p2), %v873_v2  ;;  %v875_v4 = vld [vmem:[%s1215_s1 + $0x10] sm:$0xff] (!%p738_p2)   ;;  %v876_v5 = vld [vmem:[%s1215_s1 + $0x18] sm:$0xff] (!%p738_p2)   ;;  %vm344_vm2 = vcmask (!%p738_p2), 523264  }
  0x1d   : > { %s1233_s8 = smov (!%p290_p0, %s277_s8), 1  ;;  %778 = vmatprep.subr.bf16.mxu0 (!%p738_p2), %v981_v0  ;;  %v877_v6 = vld [vmem:[%s1214_s0] sm:$0xff] (!%p738_p2)  }
  0x1e   : > { %s1235_s9 = smov (!%p279_p1, %s735_s9), 31  ;;  %s292_s12 = scalar_lea.vmem %s1217_s3, %s1233_s8 }
  0x1f   : > { %s736_s13 = sshll.u32 %s1235_s9, 2 }
  0x20   : > { %s1093_s22 = scalar_lea.vmem %s1216_s2, %s736_s13  ;;  %779 = vmatpush3.bf16.msra.mxu0 (!%p738_p2), %v874_v3 }
  0x21   : > { %780 = vmatprep.subr.bf16.mxu0 %v981_v0 }
  0x24   : > { %781 = vmatpush3.bf16.msra.mxu0 %v875_v4 }
  0x25   : > { %782 = vmatprep.subr.bf16.mxu0 %v981_v0 }
  0x28   : > { %783 = vmatpush3.bf16.msra.mxu0 %v876_v5 }
  0x2b   : > { %785 = vmatmul.mubr.msk.bf16.vlgmr.msra.gmra.mrb[0].mxu0 %vm344_vm2, %v877_v6 }
  0xfe   : > { %v382_v7 = vpop.f32.mrb[0].mxu0 }
  0xff   : > { %v786_v8 = vpop.f32.mrb[1].mxu0 }
 0x100   : > { %v385_v9 = vpop.f32.mrb[2].mxu0 }
 0x101   : > { %v389_v10 = vpack.c.bf16 %v385_v9, %v382_v7  ;;  %v787_v11 = vpop.f32.mrb[3].mxu0 }
 0x103   : > { %390 = vst.msk [vmem:[#allocation2] sm:$0xff] %vm344_vm2, %v389_v10 }
 0x104 PF: > { %v878_v12 = vld [vmem:[%s1093_s22] sm:$0xff]   ;;  %v984_v13 = vmov 0.0   ;;  %vm460_vm3 = vcmask 523264   ;;  %v879_v15 = vld [vmem:[%s1093_s22 + $0x8] sm:$0xff]   ;;  %vm985_vm4 = vmmov 0   ;;  %v880_v17 = vld [vmem:[%s1093_s22 + $0x10] sm:$0xff]  }
 0x105   : > { %788 = vmatprep.subr.bf16.mxu0 %v984_v13  ;;  %v465_v14 = vsel %vm460_vm3, %v878_v12, 0  ;;  %v468_v16 = vsel %vm460_vm3, %v879_v15, 0  ;;  %804 = vmatprep.mubr.msk.bf16.mxu0 %vm985_vm4, %v984_v13  ;;  %v471_v18 = vsel %vm460_vm3, %v880_v17, 0  ;;  %v881_v19 = vld [vmem:[%s1093_s22 + $0x18] sm:$0xff]   ;;  %v882_v21 = vld [vmem:[%s1093_s22 + $0x20] sm:$0xff]   ;;  %v883_v23 = vld [vmem:[%s1093_s22 + $0x28] sm:$0xff]  }
 0x106   : > { %789 = vmatpush3.bf16.xpose.msra.mxu0 %v465_v14  ;;  %v474_v20 = vsel %vm460_vm3, %v881_v19, 0  ;;  %v477_v22 = vsel %vm460_vm3, %v882_v21, 0  ;;  %v480_v24 = vsel %vm460_vm3, %v883_v23, 0  ;;  %v884_v25 = vld [vmem:[%s1093_s22 + $0x30] sm:$0xff]   ;;  %v885_v27 = vld [vmem:[%s1093_s22 + $0x38] sm:$0xff]   ;;  %p755_p3 = scmp.ge.s32.totalorder %s971_s18, 2 }
 0x107   : > { %790 = vmatprep.subr.bf16.mxu0 %v984_v13  ;;  %v483_v26 = vsel %vm460_vm3, %v884_v25, 0  ;;  %v486_v28 = vsel %vm460_vm3, %v885_v27, 0  ;;  %v745_v30 = vld [vmem:[%s292_s12] ss:$0 sm:$0xff]  ;;  %v986_v37 = vmov (!%p755_p3), 0   ;;  %v533_v38 = vld [vmem:[#allocation3] sm:$0xff] (!%p755_p3) }
 0x108   : > { %886 = vset.pattern.permute.xlu1 (!%p755_p3), %v986_v37  ;;  %887 = vset.pattern.permute.xlu0 (!%p755_p3), %v986_v37  ;;  %vm573_vm5 = vcmask (!%p755_p3), 7168   ;;  %v534_v41 = vld [vmem:[#allocation3 + $0x8] sm:$0xff] (!%p755_p3)  ;;  %v541_v57 = vld [vmem:[#allocation4] sm:$0xff] (!%p755_p3)  ;;  %v542_v61 = vld [vmem:[#allocation4 + $0x8] sm:$0xff] (!%p755_p3) }
 0x10a   : > { %v396_v29 = vld [vmem:[#allocation2] sm:$0xff] }
 0x10e   : > { %791 = vmatpush3.bf16.xpose.msra.mxu0 %v468_v16 }
 0x10f   : > { %792 = vmatprep.subr.bf16.mxu0 %v984_v13 }
 0x116   : > { %793 = vmatpush3.bf16.xpose.msra.mxu0 %v471_v18 }
 0x117   : > { %794 = vmatprep.subr.bf16.mxu0 %v984_v13 }
 0x11e   : > { %795 = vmatpush3.bf16.xpose.msra.mxu0 %v474_v20 }
 0x11f   : > { %796 = vmatprep.subr.bf16.mxu0 %v984_v13 }
 0x126   : > { %797 = vmatpush3.bf16.xpose.msra.mxu0 %v477_v22 }
 0x127   : > { %798 = vmatprep.subr.bf16.mxu0 %v984_v13 }
 0x12e   : > { %799 = vmatpush3.bf16.xpose.msra.mxu0 %v480_v24 }
 0x12f   : > { %800 = vmatprep.subr.bf16.mxu0 %v984_v13 }
 0x136   : > { %801 = vmatpush3.bf16.xpose.msra.mxu0 %v483_v26 }
 0x137   : > { %802 = vmatprep.subr.bf16.mxu0 %v984_v13 }
 0x13e   : > { %803 = vmatpush3.bf16.xpose.msra.mxu0 %v486_v28 }
 0x145   : > { %805 = vmatmul.mubr.msk.bf16.vlgmr.msra.gmra.mrb[0].mxu0 %vm460_vm3, %v396_v29 }
 0x215   : > { %532 = sbr.rel (%p755_p3) target bundleno = 975 (0x3cf), region = 44 }
 0x218   : > { %v522_v31 = vpop.f32.mrb[0].mxu0 }
 0x219   : > { %v1135_v32 = vadd.f32 %v745_v30, %v522_v31  ;;  %v806_v33 = vpop.f32.mrb[1].mxu0 }
 0x21a   : > { %v525_v34 = vpop.f32.mrb[2].mxu0 }
 0x21b   : > { %v1137_v35 = vadd.f32 %v745_v30, %v525_v34  ;;  %v807_v36 = vpop.f32.mrb[3].mxu0  ;;  %535 = vmax.xlane.f32.xlu0 (!%p755_p3), %v1135_v32 }
 0x21f   : > { %537 = vmax.xlane.f32.xlu0 %v1137_v35 }
 0x2a8   : > { %v536_v39 = vpop.xlane.xlu0 %535 }
 0x2a9   : > { %v539_v40 = vmax.f32 %v533_v38, %v536_v39 }
 0x2ab   : > { %v543_v42 = vsub.f32 %v533_v38, %v539_v40  ;;  %576 = vst.msk [vmem:[#allocation3] sm:$0xff] %vm573_vm5, %v539_v40  ;;  %553 = vperm.xlu1 %886, %v539_v40  }
 0x2ac   : > { %v538_v43 = vpop.xlane.xlu0 %537 }
 0x2ad   : > { %v540_v44 = vmax.f32 %v534_v41, %v538_v43  ;;  %v545_v54 = vmul.f32 1.442695, %v543_v42 }
 0x2af   : > { %v544_v45 = vsub.f32 %v534_v41, %v540_v44  ;;  %577 = vst.msk [vmem:[#allocation3 + $0x8] sm:$0xff] %vm573_vm5, %v540_v44  ;;  %558 = vperm.xlu1 %886, %v540_v44  }
 0x2b1   : > { %v547_v55 = vmul.f32 1.442695, %v544_v45 }
 0x32a   : > { %v554_v46 = vpop.permute.xlu1 %553 }
 0x32b   : > { %v561_v47 = vsub.f32 %v1135_v32, %v554_v46 }
 0x32d   : > { %v563_v48 = vmul.f32 1.442695, %v561_v47 }
 0x32e   : > { %v559_v49 = vpop.permute.xlu1 %558 }
 0x32f   : > { %888 = vpow2.f32 %v563_v48  ;;  %v562_v50 = vsub.f32 %v1137_v35, %v559_v49 }
 0x331   : > { %v565_v51 = vmul.f32 1.442695, %v562_v50 }
 0x333   : > { %890 = vpow2.f32 %v565_v51 }
 0x334   : > { %892 = vpow2.f32 %v545_v54 }
 0x335   : > { %894 = vpow2.f32 %v547_v55 }
 0x339   : > { %v889_v52 = vpop.eup %888 }
 0x33a   : > { %567 = vadd.xlane.f32.xlu0 %v889_v52 }
 0x33d   : > { %v891_v53 = vpop.eup %890 }
 0x33e   : > { %569 = vadd.xlane.f32.xlu1 %v891_v53  ;;  %v893_v56 = vpop.eup %892 }
 0x33f   : > { %v549_v58 = vmul.f32 %v893_v56, %v541_v57  ;;  %v895_v59 = vpop.eup %894 }
 0x340   : > { %v550_v63 = vmul.f32 %v895_v59, %v542_v61 }
 0x3c7   : > { %v568_v60 = vpop.xlane.xlu0 %567 }
 0x3c8   : > { %v571_v62 = vadd.f32 %v568_v60, %v549_v58 }
 0x3ca   : > { %574 = vst.msk [vmem:[#allocation4] sm:$0xff] %vm573_vm5, %v571_v62 }
 0x3cb   : > { %v570_v0 = vpop.xlane.xlu1 %569 }
 0x3cc   : > { %v572_v1 = vadd.f32 %v570_v0, %v550_v63 }
 0x3ce   : > { %575 = vst.msk [vmem:[#allocation4 + $0x8] sm:$0xff] %vm573_vm5, %v572_v1 }
 0x3cf PF: > { %581 = sbr.rel (%p275_p13) target bundleno = 1128 (0x468), region = 48  ;;  %v987_v3 = vmov (!%p275_p13), 0   ;;  %v582_v6 = vld [vmem:[#allocation3] sm:$0xff] (!%p275_p13)  ;;  %v583_v9 = vld [vmem:[#allocation3 + $0x8] sm:$0xff] (!%p275_p13) }
 0x3d0   : > { %896 = vset.pattern.permute.xlu0 (!%p275_p13), %v987_v3 }
 0x3d1   : > { %v584_v2 = vld [vmem:[#allocation4] sm:$0xff] (!%p275_p13) }
 0x3d2   : > { %897 = vlog2.f32 (!%p275_p13), %v584_v2 }
 0x3d5   : > { %v585_v4 = vld [vmem:[#allocation4 + $0x8] sm:$0xff] (!%p275_p13) }
 0x3d6   : > { %899 = vlog2.f32 %v585_v4 }
 0x3dc   : > { %v898_v5 = vpop.eup %897 }
 0x3dd   : > { %v587_v8 = vmul.f32 0.6931472, %v898_v5 }
 0x3df   : > { %v590_v11 = vadd.f32 %v587_v8, %v582_v6 }
 0x3e0   : > { %v900_v7 = vpop.eup %899 }
 0x3e1   : > { %v589_v10 = vmul.f32 0.6931472, %v900_v7  ;;  %594 = vperm.xlu0 %896, %v590_v11  }
 0x3e3   : > { %v591_v12 = vadd.f32 %v589_v10, %v583_v9 }
 0x3e5   : > { %599 = vperm.xlu0 %896, %v591_v12  }
 0x460   : > { %v595_v13 = vpop.permute.xlu0 %594 }
 0x461   : > { %v602_v14 = vsub.f32 %v1135_v32, %v595_v13 }
 0x463   : > { %604 = vst [vmem:[%s1095_s24] sm:$0xff] %v602_v14 }
 0x464   : > { %v600_v15 = vpop.permute.xlu0 %599 }
 0x465   : > { %v603_v16 = vsub.f32 %v1137_v35, %v600_v15 }
 0x467   : > { %605 = vst [vmem:[%s1095_s24 + $0x8] sm:$0xff] %v603_v16 }
 0x468 PF: > { %s625_s8 = sshll.u32 %s1095_s24, 4  ;;  %s1237_s7 = smov (%p275_p13, %s734_s7), 0  ;;  %s1159_s8 = int_to_ptr.vmem [resolvable:$true] %s625_s8 }
 0x469   : > { %s759_s12 = sshll.u32 %s1237_s7, 7  ;;  %s1168_s9 = scalar_lea.sflag [#allocation6], %s266_s5 }
 0x46a   : > { %s1164_s6 = scalar_lea.hbm %s1218_s4, %s759_s12  ;;  %s901_s10 = scalar_lea.vmem %s1159_s8, 256 }
 0x46b   : > { %p902_p4 = scmp.ne.s32.totalorder %s1159_s8, %s901_s10  ;;  %s988_s18 = smov [#allocation5]  }
 0x46c   : > { %s905_s24 = sshll.u32 %s988_s18, 4  ;;  %s906_s24 = int_to_ptr.vmem [resolvable:$false] %s905_s24 }
 0x46d   : > { %p903_p5 = pnand %p902_p4, %p1061_p6  ;;  %s907_s11 = scalar_lea.vmem %s906_s24, 512 }
 0x46e   : > { %p908_p8 = scmp.lt.s32.totalorder %s1159_s8, %s906_s24  ;;  %p909_p9 = scmp.lt.s32.totalorder %s907_s11, %s901_s10 }
 0x46f   : > { %p904_p7 = pneg %p903_p5 }
 0x470   : > { %p910_p11 = por %p909_p9, %p908_p8 }
 0x472   : > { %p911_p12 = pnand %p910_p11, %p904_p7 }
 0x474   : > { %914 = shalt.err (!%p911_p12)
}
 0x475   : > { %s915_s5 = scalar_lea.hbm %s1164_s6, 256  ;;  %s919_s14 = scalar_lea.hbm %s1218_s4, 512 }
 0x476   : > { %p916_p13 = scmp.ne.s32.totalorder %s1164_s6, %s915_s5  ;;  %p920_p2 = scmp.lt.u32.totalorder %s1164_s6, %s1218_s4 }
 0x477   : > { %p921_p3 = scmp.lt.u32.totalorder %s919_s14, %s915_s5  ;;  %p923_p5 = scmp.lt.u32.totalorder %s915_s5, %s1164_s6 }
 0x478   : > { %p917_p0 = pnand %p916_p13, %p1061_p6 }
 0x479   : > { %p922_p4 = por %p921_p3, %p920_p2 }
 0x47a   : > { %p918_p1 = pneg %p917_p0 }
 0x47b   : > { %p924_p7 = por %p923_p5, %p922_p4 }
 0x47d   : > { %p925_p8 = pnand %p924_p7, %p918_p1 }
 0x47f   : > { %928 = shalt.err (!%p925_p8)
}
 0x480   : > { %s989_s26 = smov 128   ;;  %s990_s12 = smov 256  }
 0x481   : > { %s991_s22 = smov 8  }
 0x482   : > { %808 = dma.vmem_to_hbm [thread:$0]  (%p1061_p6), %s1159_s8, 256, %s1164_s6, %s1168_s9, %s989_s26, %s990_s12, %s991_s22  }
 0x483 PF: > { %p814_p9 = scmp.ge.s32.totalorder %s979_s20, 2  ;;  %s640_s28 = sand.u32 1, %s959_s15  }
 0x484   : > { %s641_s10 = scalar_lea.sflag [#allocation6], %s640_s28 }
 0x485   : > { %p811_p11 = pnand %p814_p9, %p1066_p10 }
 0x487   : > { %954 = dma.done.wait (!%p811_p11), %s641_s10, 256  }
 0x488   : > { %956 = vsyncadd (!%p811_p11), %s641_s10, 4294967040  ;;  %s17_s20 = sadd.s32 1, %s979_s20   ;;  %s1221_s15 = smov %s963_s16 }
 0x489   : > { %p14_p12 = scmp.ge.s32.totalorder %s17_s20, 6   ;;  %s1222_s16 = smov %s967_s17 }
 0x48a   : > { %s1223_s17 = smov %s1072_s30  ;;  %s1224_s18 = smov %s975_s19 }
 0x48b   : > { %s1225_s19 = smov %s1229_s23  ;;  %16 = sbr.rel (!%p14_p12) target bundleno = 4 (0x4), region = 89 }
 0x492   :  { %646 = vsyncpa [#allocation6], 1 }
 0x493   :  { %648 = vsyncpa [#allocation6 + $0x1], 1 }

</bundles_post_ra>
